<compile_context>
chip_gen: v7x
topology: tpu7x:2x2x1
jax: 0.10.0
libtpu: 0.0.40
codegen_flags: <defaults>
</compile_context>

<pallas_src>
from functools import partial

import jax
import jax.numpy as jnp
from jax.experimental import pallas as pl
from jax.experimental.pallas import tpu as pltpu


_COLS = 512  # lane-dense last dim (multiple of 128)

# Per-generation per-buffer block byte budget and scoped-VMEM override.
# Double-buffered in + out ~= 4x block bytes.
_GEN_TILE_BYTES = {"v7": 8 << 20, "v6": 4 << 20, "v5e": 2 << 20}
_GEN_VMEM_LIMIT = {"v7": 40 << 20, "v6": 24 << 20, "v5e": None}
_DEFAULT_TILE_BYTES = 2 << 20
_DEFAULT_VMEM_LIMIT = None


def _round_up(x, m):
    return ((x + m - 1) // m) * m


def _chip_generation():
    try:
        kind = jax.devices()[0].device_kind.lower()
    except Exception:
        return "unknown"
    if "v7" in kind:
        return "v7"
    if "v6" in kind:
        return "v6"
    if "v5" in kind:
        return "v5e"  # conservative for both v5e and v5p
    return "unknown"


def _star_relu_kernel(scale_ref, bias_ref, x_ref, o_ref, *, compute_dtype):
    # scale/bias live in SMEM as (1,) f32 scalars.
    s = scale_ref[0].astype(compute_dtype)
    b = bias_ref[0].astype(compute_dtype)
    x = x_ref[...].astype(compute_dtype)
    r = jnp.maximum(x, 0)
    o_ref[...] = (s * (r * r) + b).astype(o_ref.dtype)


def star_relu(x, scale, bias):
    """Pallas StarReLU: scale * relu(x)**2 + bias (elementwise)."""
    orig_shape = x.shape
    orig_dtype = x.dtype

    n = x.size
    if n == 0:
        return x

    gen = _chip_generation()
    itemsize = jnp.dtype(orig_dtype).itemsize
    sublane = {4: 8, 2: 16, 1: 32}.get(itemsize, 8)

    # bf16 computes natively on chips with a bf16 VPU (v6e / v7x); else f32.
    if orig_dtype == jnp.bfloat16 and gen in ("v6", "v7"):
        compute_dtype = jnp.bfloat16
    else:
        compute_dtype = jnp.float32

    scale = jnp.asarray(scale, dtype=jnp.float32).reshape(-1)[:1]
    bias = jnp.asarray(bias, dtype=jnp.float32).reshape(-1)[:1]

    # Lane-dense slab (rows, _COLS). Pad only to a sublane-row multiple (a few
    # KiB max); the ragged last grid block is handled by masked writes.
    flat = x.reshape(-1)
    pad_unit = sublane * _COLS
    padded_n = _round_up(n, pad_unit)
    if padded_n != n:
        flat = jnp.pad(flat, (0, padded_n - n))
    x2 = flat.reshape(-1, _COLS)
    rows = x2.shape[0]

    # Per-generation block size (bytes -> rows), dtype-aware.
    tile_bytes = _GEN_TILE_BYTES.get(gen, _DEFAULT_TILE_BYTES)
    vmem_limit = _GEN_VMEM_LIMIT.get(gen, _DEFAULT_VMEM_LIMIT)
    tile_rows = max(sublane, (tile_bytes // (_COLS * itemsize)) // sublane * sublane)
    tile_rows = min(tile_rows, rows)

    # v7x megacore: keep >= 2 grid blocks when the row count permits so the
    # 'parallel' axis actually shards DMAs across both TensorCores.
    if gen == "v7" and rows >= 2 * sublane:
        tile_rows = min(tile_rows, _round_up(pl.cdiv(rows, 2), sublane))

    grid = (pl.cdiv(rows, tile_rows),)

    compiler_kwargs = dict(dimension_semantics=("parallel",))
    if vmem_limit is not None:
        compiler_kwargs["vmem_limit_bytes"] = vmem_limit

    out2 = pl.pallas_call(
        partial(_star_relu_kernel, compute_dtype=compute_dtype),
        out_shape=jax.ShapeDtypeStruct((rows, _COLS), orig_dtype),
        grid_spec=pl.GridSpec(
            grid=grid,
            in_specs=[
                pl.BlockSpec(memory_space=pltpu.MemorySpace.SMEM),  # scale
                pl.BlockSpec(memory_space=pltpu.MemorySpace.SMEM),  # bias
                pl.BlockSpec((tile_rows, _COLS), lambda i: (i, 0)),
            ],
            out_specs=pl.BlockSpec((tile_rows, _COLS), lambda i: (i, 0)),
        ),
        compiler_params=pltpu.CompilerParams(**compiler_kwargs),
        cost_estimate=pl.CostEstimate(
            flops=3 * padded_n,
            transcendentals=0,
            bytes_accessed=2 * padded_n * itemsize,
        ),
    )(scale, bias, x2)

    if padded_n != n:
        return out2.reshape(-1)[:n].reshape(orig_shape)
    return out2.reshape(orig_shape)


class StarReLUPallas:
    """Mirror of the PyTorch StarReLU module (forward only)."""

    def __init__(self, scale_value=1.0, bias_value=0.0,
                 scale_learnable=True, bias_learnable=True, inplace=False):
        # `inplace` / learnability flags have no effect on the forward pass.
        self.scale = jnp.full((1,), scale_value, dtype=jnp.float32)
        self.bias = jnp.full((1,), bias_value, dtype=jnp.float32)

    def __call__(self, x):
        return star_relu(x, self.scale, self.bias)


if __name__ == "__main__":
    key = jax.random.PRNGKey(0)
    # NCHW-style activation: B=2, C=4, H=W=16.
    x = jax.random.normal(key, (2, 4, 16, 16), dtype=jnp.float32)

    module = StarReLUPallas(scale_value=0.8944, bias_value=-0.4472)
    y = module(x)
    y = jax.block_until_ready(y)

    # Reference: scale * relu(x)^2 + bias.
    ref = module.scale[0] * jnp.maximum(x, 0.0) ** 2 + module.bias[0]

    assert y.shape == x.shape and y.dtype == x.dtype
    assert bool(jnp.allclose(y, ref, atol=1e-6, rtol=1e-6))
    print("KERNEL_OK")
</pallas_src>

<mosaic_0001>
module attributes {stable_mosaic.version = 11 : i64} {
  func.func @_star_relu_kernel(%arg0: i32, %arg1: memref<1xf32, #tpu.memory_space<smem>>, %arg2: memref<1xf32, #tpu.memory_space<smem>>, %arg3: memref<8x512xf32, #tpu.memory_space<vmem>>, %arg4: memref<8x512xf32, #tpu.memory_space<vmem>>) attributes {dimension_semantics = [#tpu.dimension_semantics<parallel>], iteration_bounds = array<i64: 1>, scalar_prefetch = 0 : i64, scratch_operands = 0 : i64, tpu.core_type = #tpu.core_type<tc>, window_params = [{transform_indices = @transform_0, window_bounds = array<i64: 1>}, {transform_indices = @transform_1, window_bounds = array<i64: 1>}, {transform_indices = @transform_2, window_bounds = array<i64: 8, 512>}, {transform_indices = @transform_3, window_bounds = array<i64: 8, 512>}]} {
    %c0 = arith.constant 0 : index
    %0 = memref.load %arg1[%c0] : memref<1xf32, #tpu.memory_space<smem>>
    %c0_0 = arith.constant 0 : index
    %1 = memref.load %arg2[%c0_0] : memref<1xf32, #tpu.memory_space<smem>>
    %c0_1 = arith.constant 0 : index
    %c0_2 = arith.constant 0 : index
    %2 = vector.load %arg3[%c0_1, %c0_2] : memref<8x512xf32, #tpu.memory_space<vmem>>, vector<8x512xf32>
    %cst = arith.constant 0.000000e+00 : f32
    %3 = vector.broadcast %cst : f32 to vector<8x512xf32>
    %4 = arith.maximumf %2, %3 : vector<8x512xf32>
    %5 = arith.mulf %4, %4 : vector<8x512xf32>
    %6 = vector.broadcast %0 : f32 to vector<8x512xf32>
    %7 = arith.mulf %6, %5 : vector<8x512xf32>
    %8 = vector.broadcast %1 : f32 to vector<8x512xf32>
    %9 = arith.addf %7, %8 : vector<8x512xf32>
    %c0_3 = arith.constant 0 : index
    %c0_4 = arith.constant 0 : index
    %10 = vector.load %arg4[%c0_3, %c0_4] : memref<8x512xf32, #tpu.memory_space<vmem>>, vector<8x512xf32>
    tpu.vector_store %arg4[%c0_3, %c0_4], %9 {strides = array<i32>} : memref<8x512xf32, #tpu.memory_space<vmem>>, vector<8x512xf32>,
    return
  }
  func.func @transform_0(%arg0: i32) -> i32 {
    %c0_i32 = arith.constant 0 : i32
    %c0_i32_0 = arith.constant 0 : i32
    return %c0_i32 : i32
  }
  func.func @transform_1(%arg0: i32) -> i32 {
    %c0_i32 = arith.constant 0 : i32
    %c0_i32_0 = arith.constant 0 : i32
    return %c0_i32 : i32
  }
  func.func @transform_2(%arg0: i32) -> (i32, i32) {
    %c0_i32 = arith.constant 0 : i32
    %c0_i32_0 = arith.constant 0 : i32
    return %arg0, %c0_i32 : i32, i32
  }
  func.func @transform_3(%arg0: i32) -> (i32, i32) {
    %c0_i32 = arith.constant 0 : i32
    %c0_i32_0 = arith.constant 0 : i32
    return %arg0, %c0_i32 : i32, i32
  }
}

</mosaic_0001>

<bundles_post_ra>
// kernel: tpu_custom_call.1
= control target key start
LH: loop header
LB: loop body
LE: loop exit
PB: predicated region body
PF: predicated region fallthrough
CT: control target
= control target key end

     0   :  { %10 = vsyncpa [#allocation5], 0  ;;  %s174_s0 = inlined_call_operand.<no memory space> [shape: f32[1], index: 0, kind: input, shape index: {}]   ;;  %s175_s1 = inlined_call_operand.<no memory space> [shape: f32[1], index: 1, kind: input, shape index: {}]   ;;  %s176_s2 = inlined_call_operand.hbm [shape: f32[8,512], index: 2, kind: input, shape index: {}]   ;;  %s177_s3 = inlined_call_operand.hbm [shape: f32[8,512], index: 3, kind: output, shape index: {}]  }
   0x1   :  { %11 = vsyncpa [#allocation6], 0  ;;  %s122_s12 = smov [#allocation4]   ;;  %s74_s16 = scalar_lea.hbm %s176_s2, 512 }
   0x2   :  { %s22_s13 = sshll.u32 %s122_s12, 4  ;;  %p75_p0 = scmp.ne.s32.totalorder %s176_s2, %s74_s16  ;;  %s23_s13 = int_to_ptr.vmem [resolvable:$true] %s22_s13 }
   0x3   :  { %p78_p1 = scmp.lt.u32.totalorder %s74_s16, %s176_s2 }
   0x5   :  { %p80_p2 = pnand %p78_p1, %p75_p0 }
   0x7   :  { %83 = shalt.err (!%p80_p2)
}
   0x8   :  { %s84_s21 = scalar_lea.vmem %s23_s13, 512  ;;  %p89_p4 = scmp.lt.s32.totalorder %s23_s13, %s23_s13 }
   0x9   :  { %p85_p3 = scmp.ne.s32.totalorder %s23_s13, %s84_s21  ;;  %p90_p5 = scmp.lt.s32.totalorder %s84_s21, %s84_s21 }
   0xb   :  { %p91_p6 = por %p90_p5, %p89_p4 }
   0xd   :  { %p92_p7 = pnand %p91_p6, %p85_p3 }
   0xf   :  { %95 = shalt.err (!%p92_p7)
}
  0x10   :  { %25 = dma.hbm_to_vmem [thread:$0]  %s176_s2, 512, %s23_s13, [#allocation5]  }
  0x11   :  { %118 = dma.done.wait [#allocation5], 512  }
  0x12   :  { %119 = vsyncadd [#allocation5], 4294966784  ;;  %v31_v0 = vld [vmem:[#allocation4] sm:$0xff]  ;;  %v32_v1 = vld [vmem:[#allocation4 + $0x8] sm:$0xff]  ;;  %v43_v7 = vstv %s174_s0  ;;  %v48_v12 = vstv %s175_s1  ;;  %s123_s2 = smov [#allocation7]  }
  0x13   :  { %v33_v2 = vld [vmem:[#allocation4 + $0x10] sm:$0xff]  ;;  %v35_v3 = vmax.f32 %v31_v0, 0.0  ;;  %v36_v4 = vmax.f32 %v32_v1, 0.0  ;;  %v34_v6 = vld [vmem:[#allocation4 + $0x18] sm:$0xff]  ;;  %s63_s28 = sshll.u32 %s123_s2, 4  ;;  %s64_s28 = int_to_ptr.vmem [resolvable:$true] %s63_s28 }
  0x14   :  { %v37_v5 = vmax.f32 %v33_v2, 0.0  ;;  %v38_v8 = vmax.f32 %v34_v6, 0.0  ;;  %s96_s0 = scalar_lea.vmem %s64_s28, 512  ;;  %p101_p9 = scmp.lt.s32.totalorder %s64_s28, %s64_s28 }
  0x15   :  { %v39_v9 = vmul.f32 %v35_v3, %v35_v3  ;;  %v40_v10 = vmul.f32 %v36_v4, %v36_v4  ;;  %p97_p8 = scmp.ne.s32.totalorder %s64_s28, %s96_s0  ;;  %p102_p10 = scmp.lt.s32.totalorder %s96_s0, %s96_s0 }
  0x16   :  { %v41_v11 = vmul.f32 %v37_v5, %v37_v5  ;;  %v42_v13 = vmul.f32 %v38_v8, %v38_v8 }
  0x17   :  { %v44_v14 = vmul.f32 %v43_v7, %v39_v9  ;;  %v45_v15 = vmul.f32 %v43_v7, %v40_v10  ;;  %p103_p11 = por %p102_p10, %p101_p9 }
  0x18   :  { %v46_v16 = vmul.f32 %v43_v7, %v41_v11  ;;  %v47_v17 = vmul.f32 %v43_v7, %v42_v13 }
  0x19   :  { %v49_v18 = vadd.f32 %v48_v12, %v44_v14  ;;  %v50_v19 = vadd.f32 %v48_v12, %v45_v15  ;;  %p104_p12 = pnand %p103_p11, %p97_p8 }
  0x1a   :  { %v51_v20 = vadd.f32 %v48_v12, %v46_v16  ;;  %v52_v21 = vadd.f32 %v48_v12, %v47_v17 }
  0x1b   :  { %53 = vst [vmem:[#allocation7] sm:$0xff] %v49_v18  ;;  %54 = vst [vmem:[#allocation7 + $0x8] sm:$0xff] %v50_v19 }
  0x1c   :  { %55 = vst [vmem:[#allocation7 + $0x10] sm:$0xff] %v51_v20  ;;  %56 = vst [vmem:[#allocation7 + $0x18] sm:$0xff] %v52_v21 }
  0x1d   :  { %107 = shalt.err (!%p104_p12)
}
  0x1e   :  { %s108_s30 = scalar_lea.hbm %s177_s3, 512 }
  0x1f   :  { %p109_p13 = scmp.ne.s32.totalorder %s177_s3, %s108_s30  ;;  %p112_p0 = scmp.lt.u32.totalorder %s108_s30, %s177_s3 }
  0x21   :  { %p114_p1 = pnand %p112_p0, %p109_p13 }
  0x23   :  { %117 = shalt.err (!%p114_p1)
}
  0x24   :  { %66 = dma.vmem_to_hbm [thread:$0]  %s64_s28, 512, %s177_s3, [#allocation6]  }
  0x25   :  { %120 = dma.done.wait [#allocation6], 512  }
  0x26   :  { %121 = vsyncadd [#allocation6], 4294966784 }
  0x27   :  { %70 = vsyncpa [#allocation5], 1 }
  0x28   :  { %71 = vsyncpa [#allocation6], 1 }

</bundles_post_ra>
